<compile_context>
chip_gen: v5e
topology: v5e:2x2
jax: 0.10.0
libtpu: 0.0.40
codegen_flags: <defaults>
</compile_context>

<pallas_src>
import jax
import jax.numpy as jnp
from jax.experimental import pallas as pl
from jax.experimental.pallas import tpu as pltpu

H = 128  # padded hidden width: one full 128-lane MXU tile


def phi_net_kernel(x_ref, w1_ref, b1_ref, w2_ref, b2_ref,
                   w3_ref, b3_ref, w4_ref, b4_ref, o_ref):
    bf16 = jnp.bfloat16
    # fc1 + ReLU  (bf16 operands, f32 accumulation, f32 bias/ReLU)
    h = jnp.dot(x_ref[...].astype(bf16), w1_ref[...],
                preferred_element_type=jnp.float32)
    h = jnp.maximum(h + b1_ref[...], 0.0)
    # fc2 + ReLU
    h = jnp.dot(h.astype(bf16), w2_ref[...], preferred_element_type=jnp.float32)
    h = jnp.maximum(h + b2_ref[...], 0.0)
    # fc3 + ReLU
    h = jnp.dot(h.astype(bf16), w3_ref[...], preferred_element_type=jnp.float32)
    h = jnp.maximum(h + b3_ref[...], 0.0)
    # fc4 (W4 has an appended zero column, b4 an appended 1.0 -> exact ones column)
    y = jnp.dot(h.astype(bf16), w4_ref[...], preferred_element_type=jnp.float32)
    y = y + b4_ref[...]
    o_ref[...] = y.astype(o_ref.dtype)


def make_phi_net_params(key, dim_x, dim_a, dtype=jnp.float32):
    """Deterministic init mirroring nn.Linear's uniform(-1/sqrt(fan_in), ...)."""
    dims = [dim_x, 50, 60, 50, dim_a - 1]
    params = []
    for i in range(4):
        key, kw, kb = jax.random.split(key, 3)
        fan_in, fan_out = dims[i], dims[i + 1]
        bound = 1.0 / float(fan_in) ** 0.5
        w = jax.random.uniform(kw, (fan_in, fan_out), dtype, -bound, bound)
        b = jax.random.uniform(kb, (1, fan_out), dtype, -bound, bound)
        params.append((w, b))
    return params


def prepare_padded_params(params, dim_a):
    """One-time host-side prep: zero-pad hidden dims to H lanes, fold the
    ones-concat into layer 4 (zero weight column + 1.0 bias), and cast the
    weights to bf16 (MXU-native).  Biases stay f32 (bias-add/ReLU run in f32).
    Bias padding is 0, so ReLU keeps the padded columns exactly 0."""
    (w1, b1), (w2, b2), (w3, b3), (w4, b4) = params

    def pad_to(a, rows, cols):
        return jnp.pad(a, ((0, rows - a.shape[0]), (0, cols - a.shape[1])))

    w1p = pad_to(w1, w1.shape[0], H).astype(jnp.bfloat16)
    b1p = pad_to(b1, 1, H)
    w2p = pad_to(w2, H, H).astype(jnp.bfloat16)
    b2p = pad_to(b2, 1, H)
    w3p = pad_to(w3, H, H).astype(jnp.bfloat16)
    b3p = pad_to(b3, 1, H)
    w4p = pad_to(w4, H, dim_a).astype(jnp.bfloat16)               # extra column is zeros
    b4p = jnp.concatenate([b4, jnp.ones((1, 1), b4.dtype)], -1)   # ones column (f32)
    return (w1p, b1p, w2p, b2p, w3p, b3p, w4p, b4p)


def _phi_plain(x, padded_params):
    """Plain-XLA fallback for tiny batches (same bf16/f32-accum math)."""
    w1, b1, w2, b2, w3, b3, w4, b4 = padded_params
    bf16 = jnp.bfloat16
    h = jnp.maximum(jnp.dot(x.astype(bf16), w1, preferred_element_type=jnp.float32) + b1, 0.0)
    h = jnp.maximum(jnp.dot(h.astype(bf16), w2, preferred_element_type=jnp.float32) + b2, 0.0)
    h = jnp.maximum(jnp.dot(h.astype(bf16), w3, preferred_element_type=jnp.float32) + b3, 0.0)
    return jnp.dot(h.astype(bf16), w4, preferred_element_type=jnp.float32) + b4


def _round_down_16(v):
    return max(16, (v // 16) * 16)


def _round_up_16(v):
    return max(16, -(-v // 16) * 16)


def _choose_tb(B, block_b):
    """Batch tile: multiple of 16 (bf16 sublane packing), large (amortize the
    ~0.35us/step overhead), and yielding >= 2 (ideally even) grid tiles so both
    v7x TensorCores get work (neutral on single-TC v5e/v6e)."""
    tb = _round_down_16(min(block_b, B))
    num_tiles = pl.cdiv(B, tb)
    if num_tiles == 1 and B > 16:
        tb = _round_up_16(pl.cdiv(B, 2))
        num_tiles = pl.cdiv(B, tb)
    elif num_tiles > 1 and num_tiles % 2 == 1:
        cand = _round_up_16(pl.cdiv(B, num_tiles + 1))
        if pl.cdiv(B, cand) % 2 == 0:
            tb = cand
            num_tiles = pl.cdiv(B, cand)
    return tb, num_tiles


def phi_net_forward(x, padded_params, dim_a, *, block_b=4096, min_pallas_batch=256):
    """x: (batch, dim_x) or (dim_x,). Returns (batch, dim_a) or (dim_a,)."""
    squeeze = x.ndim == 1
    if squeeze:
        x = x[None, :]
    B, dim_x = x.shape

    # Small-batch short-circuit: fixed pallas_call overhead would dominate.
    if B < min_pallas_batch:
        out = _phi_plain(x, padded_params)
        return out[0] if squeeze else out

    w1, b1, w2, b2, w3, b3, w4, b4 = padded_params
    TB, num_tiles = _choose_tb(B, block_b)

    # Advisory cost estimate (helps XLA schedule neighbors of the custom call).
    flops = 2 * B * (dim_x * H + H * H + H * H + H * dim_a)
    weight_bytes = sum(int(a.size) * a.dtype.itemsize
                       for a in (w1, b1, w2, b2, w3, b3, w4, b4))
    bytes_accessed = B * dim_x * 4 + weight_bytes + B * dim_a * 4
    cost = pl.CostEstimate(flops=flops, transcendentals=0,
                           bytes_accessed=bytes_accessed)

    resident = lambda i: (0, 0)  # weights/biases: same block every step -> stay in VMEM
    # Partial last block (B % TB != 0) is handled by Pallas: OOB input rows are
    # unspecified but per-row math means only masked-out output rows see them.
    out = pl.pallas_call(
        phi_net_kernel,
        out_shape=jax.ShapeDtypeStruct((B, dim_a), x.dtype),
        grid=(num_tiles,),
        in_specs=[
            pl.BlockSpec((TB, dim_x), lambda i: (i, 0)),  # x: tiled over batch
            pl.BlockSpec(w1.shape, resident),
            pl.BlockSpec(b1.shape, resident),
            pl.BlockSpec(w2.shape, resident),
            pl.BlockSpec(b2.shape, resident),
            pl.BlockSpec(w3.shape, resident),
            pl.BlockSpec(b3.shape, resident),
            pl.BlockSpec(w4.shape, resident),
            pl.BlockSpec(b4.shape, resident),
        ],
        out_specs=pl.BlockSpec((TB, dim_a), lambda i: (i, 0)),
        compiler_params=pltpu.CompilerParams(
            dimension_semantics=("parallel",),  # megacore: shard batch tiles across TCs
        ),
        cost_estimate=cost,
    )(x, w1, b1, w2, b2, w3, b3, w4, b4)

    return out[0] if squeeze else out


if __name__ == "__main__":
    dim_x, dim_a = 16, 5

    params = make_phi_net_params(jax.random.PRNGKey(0), dim_x, dim_a)
    padded = prepare_padded_params(params, dim_a)

    def ref_forward(xin):
        h = xin
        for (w, b) in params[:3]:
            h = jnp.maximum(h @ w + b, 0.0)
        y = h @ params[3][0] + params[3][1]
        ones = jnp.ones(y.shape[:-1] + (1,), y.dtype)
        return jnp.concatenate([y, ones], axis=-1)

    key = jax.random.PRNGKey(0)
    _, kx = jax.random.split(key)

    # (a) Pallas path: B=512 -> 2 even tiles of 256 (both v7x TCs busy).
    B = 512
    x = jax.random.normal(kx, (B, dim_x), jnp.float32)
    out = jax.block_until_ready(phi_net_forward(x, padded, dim_a))
    ref = ref_forward(x)
    assert out.shape == (B, dim_a)
    assert jnp.allclose(out, ref, atol=2e-2, rtol=2e-2)       # bf16 operands, f32 accum
    assert jnp.all(out[:, -1] == 1.0)                          # ones column is exact

    # (b) Ragged batch: partial last tile handled in-kernel (no host pad/slice).
    Br = 500
    outr = jax.block_until_ready(phi_net_forward(x[:Br], padded, dim_a, block_b=256))
    assert outr.shape == (Br, dim_a)
    assert jnp.allclose(outr, ref[:Br], atol=2e-2, rtol=2e-2)
    assert jnp.all(outr[:, -1] == 1.0)

    # (c) 1-D vector input / small-batch XLA fallback.
    outv = jax.block_until_ready(phi_net_forward(x[0], padded, dim_a))
    assert outv.shape == (dim_a,)
    assert jnp.allclose(outv, ref[0], atol=2e-2, rtol=2e-2)

    print("KERNEL_OK")
</pallas_src>

<mosaic_0001>
module attributes {stable_mosaic.version = 11 : i64} {
  func.func @phi_net_kernel(%arg0: i32, %arg1: memref<256x16xf32, #tpu.memory_space<vmem>>, %arg2: memref<16x128xbf16, #tpu.memory_space<vmem>>, %arg3: memref<1x128xf32, #tpu.memory_space<vmem>>, %arg4: memref<128x128xbf16, #tpu.memory_space<vmem>>, %arg5: memref<1x128xf32, #tpu.memory_space<vmem>>, %arg6: memref<128x128xbf16, #tpu.memory_space<vmem>>, %arg7: memref<1x128xf32, #tpu.memory_space<vmem>>, %arg8: memref<128x5xbf16, #tpu.memory_space<vmem>>, %arg9: memref<1x5xf32, #tpu.memory_space<vmem>>, %arg10: memref<256x5xf32, #tpu.memory_space<vmem>>) attributes {dimension_semantics = [#tpu.dimension_semantics<parallel>], iteration_bounds = array<i64: 2>, scalar_prefetch = 0 : i64, scratch_operands = 0 : i64, tpu.core_type = #tpu.core_type<tc>, window_params = [{transform_indices = @transform_0, window_bounds = array<i64: 256, 16>}, {pipeline_mode = #tpu.pipeline_mode<synchronous>, transform_indices = @transform_1, window_bounds = array<i64: 16, 128>}, {pipeline_mode = #tpu.pipeline_mode<synchronous>, transform_indices = @transform_2, window_bounds = array<i64: 1, 128>}, {pipeline_mode = #tpu.pipeline_mode<synchronous>, transform_indices = @transform_3, window_bounds = array<i64: 128, 128>}, {pipeline_mode = #tpu.pipeline_mode<synchronous>, transform_indices = @transform_4, window_bounds = array<i64: 1, 128>}, {pipeline_mode = #tpu.pipeline_mode<synchronous>, transform_indices = @transform_5, window_bounds = array<i64: 128, 128>}, {pipeline_mode = #tpu.pipeline_mode<synchronous>, transform_indices = @transform_6, window_bounds = array<i64: 1, 128>}, {pipeline_mode = #tpu.pipeline_mode<synchronous>, transform_indices = @transform_7, window_bounds = array<i64: 128, 5>}, {pipeline_mode = #tpu.pipeline_mode<synchronous>, transform_indices = @transform_8, window_bounds = array<i64: 1, 5>}, {transform_indices = @transform_9, window_bounds = array<i64: 256, 5>}]} {
    %c0 = arith.constant 0 : index
    %c0_0 = arith.constant 0 : index
    %0 = vector.load %arg1[%c0, %c0_0] : memref<256x16xf32, #tpu.memory_space<vmem>>, vector<256x16xf32>
    %1 = arith.truncf %0 : vector<256x16xf32> to vector<256x16xbf16>
    %c0_1 = arith.constant 0 : index
    %c0_2 = arith.constant 0 : index
    %2 = vector.load %arg2[%c0_1, %c0_2] : memref<16x128xbf16, #tpu.memory_space<vmem>>, vector<16x128xbf16>
    %cst = arith.constant dense<0.000000e+00> : vector<256x128xf32>
    %3 = tpu.matmul %1, %2, %cst {dimension_numbers = #tpu.dot_dimension_numbers<[1], [0], [0], [1], [0, 0, 1, 1], [], []>} : vector<256x16xbf16>, vector<16x128xbf16>, vector<256x128xf32> -> vector<256x128xf32>
    %c0_3 = arith.constant 0 : index
    %c0_4 = arith.constant 0 : index
    %4 = vector.load %arg3[%c0_3, %c0_4] : memref<1x128xf32, #tpu.memory_space<vmem>>, vector<1x128xf32>
    %5 = vector.broadcast %4 : vector<1x128xf32> to vector<256x128xf32>
    %6 = arith.addf %3, %5 : vector<256x128xf32>
    %cst_5 = arith.constant 0.000000e+00 : f32
    %7 = vector.broadcast %cst_5 : f32 to vector<256x128xf32>
    %8 = arith.maximumf %6, %7 : vector<256x128xf32>
    %9 = arith.truncf %8 : vector<256x128xf32> to vector<256x128xbf16>
    %c0_6 = arith.constant 0 : index
    %c0_7 = arith.constant 0 : index
    %10 = vector.load %arg4[%c0_6, %c0_7] : memref<128x128xbf16, #tpu.memory_space<vmem>>, vector<128x128xbf16>
    %cst_8 = arith.constant dense<0.000000e+00> : vector<256x128xf32>
    %11 = tpu.matmul %9, %10, %cst_8 {dimension_numbers = #tpu.dot_dimension_numbers<[1], [0], [0], [1], [0, 0, 1, 1], [], []>} : vector<256x128xbf16>, vector<128x128xbf16>, vector<256x128xf32> -> vector<256x128xf32>
    %c0_9 = arith.constant 0 : index
    %c0_10 = arith.constant 0 : index
    %12 = vector.load %arg5[%c0_9, %c0_10] : memref<1x128xf32, #tpu.memory_space<vmem>>, vector<1x128xf32>
    %13 = vector.broadcast %12 : vector<1x128xf32> to vector<256x128xf32>
    %14 = arith.addf %11, %13 : vector<256x128xf32>
    %cst_11 = arith.constant 0.000000e+00 : f32
    %15 = vector.broadcast %cst_11 : f32 to vector<256x128xf32>
    %16 = arith.maximumf %14, %15 : vector<256x128xf32>
    %17 = arith.truncf %16 : vector<256x128xf32> to vector<256x128xbf16>
    %c0_12 = arith.constant 0 : index
    %c0_13 = arith.constant 0 : index
    %18 = vector.load %arg6[%c0_12, %c0_13] : memref<128x128xbf16, #tpu.memory_space<vmem>>, vector<128x128xbf16>
    %cst_14 = arith.constant dense<0.000000e+00> : vector<256x128xf32>
    %19 = tpu.matmul %17, %18, %cst_14 {dimension_numbers = #tpu.dot_dimension_numbers<[1], [0], [0], [1], [0, 0, 1, 1], [], []>} : vector<256x128xbf16>, vector<128x128xbf16>, vector<256x128xf32> -> vector<256x128xf32>
    %c0_15 = arith.constant 0 : index
    %c0_16 = arith.constant 0 : index
    %20 = vector.load %arg7[%c0_15, %c0_16] : memref<1x128xf32, #tpu.memory_space<vmem>>, vector<1x128xf32>
    %21 = vector.broadcast %20 : vector<1x128xf32> to vector<256x128xf32>
    %22 = arith.addf %19, %21 : vector<256x128xf32>
    %cst_17 = arith.constant 0.000000e+00 : f32
    %23 = vector.broadcast %cst_17 : f32 to vector<256x128xf32>
    %24 = arith.maximumf %22, %23 : vector<256x128xf32>
    %25 = arith.truncf %24 : vector<256x128xf32> to vector<256x128xbf16>
    %c0_18 = arith.constant 0 : index
    %c0_19 = arith.constant 0 : index
    %26 = vector.load %arg8[%c0_18, %c0_19] : memref<128x5xbf16, #tpu.memory_space<vmem>>, vector<128x5xbf16>
    %cst_20 = arith.constant dense<0.000000e+00> : vector<256x5xf32>
    %27 = tpu.matmul %25, %26, %cst_20 {dimension_numbers = #tpu.dot_dimension_numbers<[1], [0], [0], [1], [0, 0, 1, 1], [], []>} : vector<256x128xbf16>, vector<128x5xbf16>, vector<256x5xf32> -> vector<256x5xf32>
    %c0_21 = arith.constant 0 : index
    %c0_22 = arith.constant 0 : index
    %28 = vector.load %arg9[%c0_21, %c0_22] : memref<1x5xf32, #tpu.memory_space<vmem>>, vector<1x5xf32>
    %29 = vector.broadcast %28 : vector<1x5xf32> to vector<256x5xf32>
    %30 = arith.addf %27, %29 : vector<256x5xf32>
    %c0_23 = arith.constant 0 : index
    %c0_24 = arith.constant 0 : index
    %31 = vector.load %arg10[%c0_23, %c0_24] : memref<256x5xf32, #tpu.memory_space<vmem>>, vector<256x5xf32>
    tpu.vector_store %arg10[%c0_23, %c0_24], %30 {strides = array<i32>} : memref<256x5xf32, #tpu.memory_space<vmem>>, vector<256x5xf32>,
    return
  }
  func.func @transform_0(%arg0: i32) -> (i32, i32) {
    %c0_i32 = arith.constant 0 : i32
    %c0_i32_0 = arith.constant 0 : i32
    return %arg0, %c0_i32 : i32, i32
  }
  func.func @transform_1(%arg0: i32) -> (i32, i32) {
    %c0_i32 = arith.constant 0 : i32
    %c0_i32_0 = arith.constant 0 : i32
    %c0_i32_1 = arith.constant 0 : i32
    return %c0_i32, %c0_i32_0 : i32, i32
  }
  func.func @transform_2(%arg0: i32) -> (i32, i32) {
    %c0_i32 = arith.constant 0 : i32
    %c0_i32_0 = arith.constant 0 : i32
    %c0_i32_1 = arith.constant 0 : i32
    return %c0_i32, %c0_i32_0 : i32, i32
  }
  func.func @transform_3(%arg0: i32) -> (i32, i32) {
    %c0_i32 = arith.constant 0 : i32
    %c0_i32_0 = arith.constant 0 : i32
    %c0_i32_1 = arith.constant 0 : i32
    return %c0_i32, %c0_i32_0 : i32, i32
  }
  func.func @transform_4(%arg0: i32) -> (i32, i32) {
    %c0_i32 = arith.constant 0 : i32
    %c0_i32_0 = arith.constant 0 : i32
    %c0_i32_1 = arith.constant 0 : i32
    return %c0_i32, %c0_i32_0 : i32, i32
  }
  func.func @transform_5(%arg0: i32) -> (i32, i32) {
    %c0_i32 = arith.constant 0 : i32
    %c0_i32_0 = arith.constant 0 : i32
    %c0_i32_1 = arith.constant 0 : i32
    return %c0_i32, %c0_i32_0 : i32, i32
  }
  func.func @transform_6(%arg0: i32) -> (i32, i32) {
    %c0_i32 = arith.constant 0 : i32
    %c0_i32_0 = arith.constant 0 : i32
    %c0_i32_1 = arith.constant 0 : i32
    return %c0_i32, %c0_i32_0 : i32, i32
  }
  func.func @transform_7(%arg0: i32) -> (i32, i32) {
    %c0_i32 = arith.constant 0 : i32
    %c0_i32_0 = arith.constant 0 : i32
    %c0_i32_1 = arith.constant 0 : i32
    return %c0_i32, %c0_i32_0 : i32, i32
  }
  func.func @transform_8(%arg0: i32) -> (i32, i32) {
    %c0_i32 = arith.constant 0 : i32
    %c0_i32_0 = arith.constant 0 : i32
    %c0_i32_1 = arith.constant 0 : i32
    return %c0_i32, %c0_i32_0 : i32, i32
  }
  func.func @transform_9(%arg0: i32) -> (i32, i32) {
    %c0_i32 = arith.constant 0 : i32
    %c0_i32_0 = arith.constant 0 : i32
    return %arg0, %c0_i32 : i32, i32
  }
}

</mosaic_0001>

<bundles_post_ra>
// kernel: tpu_custom_call.1
= control target key start
LH: loop header
LB: loop body
LE: loop exit
PB: predicated region body
PF: predicated region fallthrough
CT: control target
= control target key end

     0   :  { %s1461_s30 = smov 0   ;;  %s1824_s0 = inlined_call_operand.vmem [shape: f32[512,16], index: 0, kind: input, shape index: {}]   ;;  %s1825_s1 = inlined_call_operand.vmem [shape: bf16[16,128], index: 1, kind: input, shape index: {}]   ;;  %s1826_s2 = inlined_call_operand.vmem [shape: f32[1,128], index: 2, kind: input, shape index: {}]   ;;  %s1827_s3 = inlined_call_operand.vmem [shape: bf16[128,128], index: 3, kind: input, shape index: {}]   ;;  %s1828_s4 = inlined_call_operand.vmem [shape: f32[1,128], index: 4, kind: input, shape index: {}]   ;;  %s1829_s5 = inlined_call_operand.vmem [shape: bf16[128,128], index: 5, kind: input, shape index: {}]   ;;  %s1830_s6 = inlined_call_operand.vmem [shape: f32[1,128], index: 6, kind: input, shape index: {}]   ;;  %s1831_s7 = inlined_call_operand.vmem [shape: bf16[128,5], index: 7, kind: input, shape index: {}]   ;;  %s1832_s8 = inlined_call_operand.vmem [shape: f32[1,5], index: 8, kind: input, shape index: {}]   ;;  %s1833_s9 = inlined_call_operand.vmem [shape: f32[512,5], index: 9, kind: output, shape index: {}]  }
   0x1 LB: > { %s1239_s10 = sadd.s32 4294967295, %s1409_s30   ;;  %p1243_p0 = scmp.ge.s32.totalorder %s1409_s30, 1  ;;  %s1409_s30 = sphi %s1461_s30, %s19_s30  }
   0x2   : > { %p288_p1 = scmp.lt.s32.totalorder %s1409_s30, 3 }
   0x4   : > { %p289_p2 = pnand %p1243_p0, %p288_p1 }
   0x5   : > { %s1244_s13 = sshll.u32 (!%p289_p2), %s1239_s10, 5 }
   0x6   : > { %292 = sbr.rel (%p289_p2) target bundleno = 826 (0x33a), region = 56  ;;  %p325_p3 = scmp.lt.s32.totalorder (!%p289_p2), %s1244_s13, 63 }
   0xb   : > { %v1366_v0 = vld [vmem:[%s1825_s1] sm:$0xff]  ;;  %s1835_s13 = smov (!%p325_p3, %s1244_s13), 63  ;;  %vm397_vm0 = vcmask 130048   ;;  %v1374_v16 = vld [vmem:[%s1827_s3 + $0x38] sm:$0xff]  ;;  %v1373_v20 = vld [vmem:[%s1827_s3 + $0x30] sm:$0xff]  ;;  %vm1150_vm1 = vcmask 39936  }
   0xc   : > { %453 = vmatpush.bf16.msra.mxu0 %v1366_v0  ;;  %s1245_s14 = sshll.u32 %s1835_s13, 3  ;;  %651 = vmatpush.bf16.msra.mxu1 %v1374_v16  ;;  %v1372_v21 = vld [vmem:[%s1827_s3 + $0x28] sm:$0xff]  ;;  %v1371_v22 = vld [vmem:[%s1827_s3 + $0x20] sm:$0xff]  ;;  %v1370_v25 = vld [vmem:[%s1827_s3 + $0x18] sm:$0xff] }
   0xd   : > { %s1480_s17 = scalar_lea.vmem %s1824_s0, %s1245_s14  ;;  %v1369_v27 = vld [vmem:[%s1827_s3 + $0x10] sm:$0xff]  ;;  %v1368_v28 = vld [vmem:[%s1827_s3 + $0x8] sm:$0xff]  ;;  %v1367_v29 = vld [vmem:[%s1827_s3] sm:$0xff]  ;;  %s1709_s23 = scalar_lea.vmem %s1833_s9, %s1245_s14 }
   0xe   : > { %v337_v1 = vld [vmem:[%s1480_s17] sm:$0xff]  ;;  %v338_v2 = vld [vmem:[%s1480_s17 + $0x8] sm:$0xff]  ;;  %v339_v4 = vld [vmem:[%s1480_s17 + $0x10] sm:$0xff] }
   0xf   : > { %v369_v3 = vpack.c.bf16 %v338_v2, %v337_v1  ;;  %v340_v5 = vld [vmem:[%s1480_s17 + $0x18] sm:$0xff]  ;;  %v341_v7 = vld [vmem:[%s1480_s17 + $0x20] sm:$0xff]  ;;  %v342_v8 = vld [vmem:[%s1480_s17 + $0x28] sm:$0xff] }
  0x10   : > { %v370_v6 = vpack.c.bf16 %v340_v5, %v339_v4  ;;  %v371_v9 = vpack.c.bf16 %v342_v8, %v341_v7  ;;  %v343_v10 = vld [vmem:[%s1480_s17 + $0x30] sm:$0xff]  ;;  %v344_v11 = vld [vmem:[%s1480_s17 + $0x38] sm:$0xff]  ;;  %v345_v13 = vld [vmem:[%s1480_s17 + $0x40] sm:$0xff]  ;;  %652 = vmatpush.bf16.msra.mxu1 %v1373_v20 }
  0x11   : > { %1252 = vmatmul.msk.bf16.vlgmr.msra.gmra.mxu0 %vm397_vm0, %v369_v3  ;;  %v372_v12 = vpack.c.bf16 %v344_v11, %v343_v10  ;;  %v346_v14 = vld [vmem:[%s1480_s17 + $0x48] sm:$0xff]  ;;  %v347_v17 = vld [vmem:[%s1480_s17 + $0x50] sm:$0xff]  ;;  %v348_v18 = vld [vmem:[%s1480_s17 + $0x58] sm:$0xff] }
  0x12   : > { %v373_v15 = vpack.c.bf16 %v346_v14, %v345_v13  ;;  %v374_v19 = vpack.c.bf16 %v348_v18, %v347_v17  ;;  %v349_v23 = vld [vmem:[%s1480_s17 + $0x60] sm:$0xff]  ;;  %v350_v24 = vld [vmem:[%s1480_s17 + $0x68] sm:$0xff]  ;;  %v351_v30 = vld [vmem:[%s1480_s17 + $0x70] sm:$0xff] }
  0x13   : > { %v375_v26 = vpack.c.bf16 %v350_v24, %v349_v23  ;;  %v352_v31 = vld [vmem:[%s1480_s17 + $0x78] sm:$0xff]  ;;  %v353_v33 = vld [vmem:[%s1480_s17 + $0x80] sm:$0xff]  ;;  %v354_v34 = vld [vmem:[%s1480_s17 + $0x88] sm:$0xff] }
  0x14   : > { %653 = vmatpush.bf16.msra.mxu1 %v1372_v21  ;;  %v376_v32 = vpack.c.bf16 %v352_v31, %v351_v30  ;;  %v377_v35 = vpack.c.bf16 %v354_v34, %v353_v33  ;;  %v1535_v37 = vld [vmem:[%s1826_s2] ss:$0 sm:$0xff]  ;;  %v355_v43 = vld [vmem:[%s1480_s17 + $0x90] sm:$0xff]  ;;  %v356_v44 = vld [vmem:[%s1480_s17 + $0x98] sm:$0xff] }
  0x15   : > { %v378_v46 = vpack.c.bf16 %v356_v44, %v355_v43  ;;  %v357_v53 = vld [vmem:[%s1480_s17 + $0xa0] sm:$0xff]  ;;  %v358_v54 = vld [vmem:[%s1480_s17 + $0xa8] sm:$0xff]  ;;  %v359_v63 = vld [vmem:[%s1480_s17 + $0xb0] sm:$0xff] }
  0x16   : > { %v379_v56 = vpack.c.bf16 %v358_v54, %v357_v53  ;;  %v360_v0 = vld [vmem:[%s1480_s17 + $0xb8] sm:$0xff]  ;;  %v362_v10 = vld [vmem:[%s1480_s17 + $0xc8] sm:$0xff]  ;;  %v365_v30 = vld [vmem:[%s1480_s17 + $0xe0] sm:$0xff] }
  0x17   : > { %v380_v2 = vpack.c.bf16 %v360_v0, %v359_v63  ;;  %v364_v20 = vld [vmem:[%s1480_s17 + $0xd8] sm:$0xff]  ;;  %v366_v31 = vld [vmem:[%s1480_s17 + $0xe8] sm:$0xff]  ;;  %v1381_v33 = vld [vmem:[%s1829_s5 + $0x30] sm:$0xff] }
  0x18   : > { %654 = vmatpush.bf16.msra.mxu1 %v1371_v22  ;;  %v383_v34 = vpack.c.bf16 %v366_v31, %v365_v30 }
  0x1c   : > { %655 = vmatpush.bf16.msra.mxu1 %v1370_v25 }
  0x20   : > { %656 = vmatpush.bf16.msra.mxu1 %v1369_v27  ;;  %v1382_v27 = vld [vmem:[%s1829_s5 + $0x38] sm:$0xff] }
  0x21   : > { %1253 = vmatmul.msk.bf16.gmra.mxu0 %vm397_vm0, %v370_v6  ;;  %856 = vmatpush.bf16.msra.mxu2 %v1382_v27 }
  0x24   : > { %657 = vmatpush.bf16.msra.mxu1 %v1368_v28 }
  0x25   : > { %857 = vmatpush.bf16.msra.mxu2 %v1381_v33 }
  0x28   : > { %658 = vmatpush.bf16.msra.mxu1 %v1367_v29 }
  0x31   : > { %1254 = vmatmul.msk.bf16.gmra.mxu0 %vm397_vm0, %v371_v9  ;;  %v361_v9 = vld [vmem:[%s1480_s17 + $0xc0] sm:$0xff] }
  0x41   : > { %1255 = vmatmul.msk.bf16.gmra.mxu0 %vm397_vm0, %v372_v12  ;;  %v381_v12 = vpack.c.bf16 %v362_v10, %v361_v9 }
  0x51   : > { %1256 = vmatmul.msk.bf16.gmra.mxu0 %vm397_vm0, %v373_v15 }
  0x61   : > { %1257 = vmatmul.msk.bf16.gmra.mxu0 %vm397_vm0, %v374_v19  ;;  %v363_v19 = vld [vmem:[%s1480_s17 + $0xd0] sm:$0xff] }
  0x62   : > { %v382_v22 = vpack.c.bf16 %v364_v20, %v363_v19 }
  0x71   : > { %1258 = vmatmul.msk.bf16.gmra.mxu0 %vm397_vm0, %v375_v26 }
  0x81   : > { %1259 = vmatmul.msk.bf16.gmra.mxu0 %vm397_vm0, %v376_v32 }
  0x8e   : > { %v455_v36 = vpop.f32.mrf.mxu0 }
  0x8f   : > { %v456_v38 = vadd.f32 %v1535_v37, %v455_v36  ;;  %v1380_v36 = vld [vmem:[%s1829_s5 + $0x28] sm:$0xff] }
  0x90   : > { %858 = vmatpush.bf16.msra.mxu2 %v1380_v36 }
  0x91   : > { %1260 = vmatmul.msk.bf16.gmra.mxu0 %vm397_vm0, %v377_v35  ;;  %v535_v41 = vmax.f32 %v456_v38, 0.0  ;;  %v1379_v38 = vld [vmem:[%s1829_s5 + $0x20] sm:$0xff] }
  0x94   : > { %859 = vmatpush.bf16.msra.mxu2 %v1379_v38 }
  0x96   : > { %v457_v39 = vpop.f32.mrf.mxu0 }
  0x97   : > { %v458_v40 = vadd.f32 %v1535_v37, %v457_v39 }
  0x99   : > { %v536_v42 = vmax.f32 %v458_v40, 0.0 }
  0x9b   : > { %v567_v45 = vpack.c.bf16 %v536_v42, %v535_v41  ;;  %v1378_v42 = vld [vmem:[%s1829_s5 + $0x18] sm:$0xff] }
  0x9c   : > { %860 = vmatpush.bf16.msra.mxu2 %v1378_v42 }
  0x9d   : > { %659 = vmatmul.bf16.vlgmr.msra.gmra.mxu1 %v567_v45  ;;  %v367_v45 = vld [vmem:[%s1480_s17 + $0xf0] sm:$0xff] }
  0x9e   : > { %v460_v47 = vpop.f32.mrf.mxu0 }
  0x9f   : > { %v461_v48 = vadd.f32 %v1535_v37, %v460_v47 }
  0xa1   : > { %1261 = vmatmul.msk.bf16.gmra.mxu0 %vm397_vm0, %v378_v46  ;;  %v537_v51 = vmax.f32 %v461_v48, 0.0  ;;  %v368_v46 = vld [vmem:[%s1480_s17 + $0xf8] sm:$0xff]  ;;  %v1377_v48 = vld [vmem:[%s1829_s5 + $0x10] sm:$0xff] }
  0xa2   : > { %861 = vmatpush.bf16.msra.mxu2 %v1377_v48 }
  0xa6   : > { %v462_v49 = vpop.f32.mrf.mxu0 }
  0xa7   : > { %v463_v50 = vadd.f32 %v1535_v37, %v462_v49  ;;  %v384_v49 = vpack.c.bf16 %v368_v46, %v367_v45 }
  0xa9   : > { %v538_v52 = vmax.f32 %v463_v50, 0.0 }
  0xab   : > { %v568_v55 = vpack.c.bf16 %v538_v52, %v537_v51  ;;  %v1376_v51 = vld [vmem:[%s1829_s5 + $0x8] sm:$0xff]  ;;  %v1375_v52 = vld [vmem:[%s1829_s5] sm:$0xff] }
  0xac   : > { %862 = vmatpush.bf16.msra.mxu2 %v1376_v51 }
  0xad   : > { %664 = vmatmul.bf16.gmra.mxu1 %v568_v55 }
  0xae   : > { %v465_v57 = vpop.f32.mrf.mxu0 }
  0xaf   : > { %v466_v58 = vadd.f32 %v1535_v37, %v465_v57 }
  0xb0   : > { %863 = vmatpush.bf16.msra.mxu2 %v1375_v52 }
  0xb1   : > { %1262 = vmatmul.msk.bf16.gmra.mxu0 %vm397_vm0, %v379_v56  ;;  %v539_v61 = vmax.f32 %v466_v58, 0.0 }
  0xb6   : > { %v467_v59 = vpop.f32.mrf.mxu0 }
  0xb7   : > { %v468_v60 = vadd.f32 %v1535_v37, %v467_v59 }
  0xb9   : > { %v540_v62 = vmax.f32 %v468_v60, 0.0 }
  0xbb   : > { %v569_v1 = vpack.c.bf16 %v540_v62, %v539_v61 }
  0xbd   : > { %669 = vmatmul.bf16.gmra.mxu1 %v569_v1 }
  0xbe   : > { %v470_v3 = vpop.f32.mrf.mxu0 }
  0xbf   : > { %v471_v4 = vadd.f32 %v1535_v37, %v470_v3  ;;  %v1604_v3 = vld [vmem:[%s1828_s4] ss:$0 sm:$0xff] }
  0xc1   : > { %1263 = vmatmul.msk.bf16.gmra.mxu0 %vm397_vm0, %v380_v2  ;;  %v541_v7 = vmax.f32 %v471_v4, 0.0 }
  0xc6   : > { %v472_v5 = vpop.f32.mrf.mxu0 }
  0xc7   : > { %v473_v6 = vadd.f32 %v1535_v37, %v472_v5 }
  0xc9   : > { %v542_v8 = vmax.f32 %v473_v6, 0.0 }
  0xcb   : > { %v570_v11 = vpack.c.bf16 %v542_v8, %v541_v7 }
  0xcd   : > { %674 = vmatmul.bf16.gmra.mxu1 %v570_v11 }
  0xce   : > { %v475_v13 = vpop.f32.mrf.mxu0 }
  0xcf   : > { %v476_v14 = vadd.f32 %v1535_v37, %v475_v13 }
  0xd1   : > { %1264 = vmatmul.msk.bf16.gmra.mxu0 %vm397_vm0, %v381_v12  ;;  %v543_v17 = vmax.f32 %v476_v14, 0.0 }
  0xd6   : > { %v477_v15 = vpop.f32.mrf.mxu0 }
  0xd7   : > { %v478_v16 = vadd.f32 %v1535_v37, %v477_v15 }
  0xd9   : > { %v544_v18 = vmax.f32 %v478_v16, 0.0 }
  0xdb   : > { %v571_v21 = vpack.c.bf16 %v544_v18, %v543_v17 }
  0xdd   : > { %679 = vmatmul.bf16.gmra.mxu1 %v571_v21 }
  0xde   : > { %v480_v23 = vpop.f32.mrf.mxu0 }
  0xdf   : > { %v481_v24 = vadd.f32 %v1535_v37, %v480_v23 }
  0xe1   : > { %1265 = vmatmul.msk.bf16.gmra.mxu0 %vm397_vm0, %v382_v22  ;;  %v545_v28 = vmax.f32 %v481_v24, 0.0 }
  0xe6   : > { %v482_v25 = vpop.f32.mrf.mxu0 }
  0xe7   : > { %v483_v26 = vadd.f32 %v1535_v37, %v482_v25 }
  0xe9   : > { %v546_v29 = vmax.f32 %v483_v26, 0.0 }
  0xeb   : > { %v572_v32 = vpack.c.bf16 %v546_v29, %v545_v28 }
  0xed   : > { %684 = vmatmul.bf16.gmra.mxu1 %v572_v32 }
  0xee   : > { %v485_v35 = vpop.f32.mrf.mxu0 }
  0xef   : > { %v486_v39 = vadd.f32 %v1535_v37, %v485_v35 }
  0xf1   : > { %1266 = vmatmul.msk.bf16.gmra.mxu0 %vm397_vm0, %v383_v34  ;;  %v547_v43 = vmax.f32 %v486_v39, 0.0 }
  0xf6   : > { %v487_v40 = vpop.f32.mrf.mxu0 }
  0xf7   : > { %v488_v41 = vadd.f32 %v1535_v37, %v487_v40 }
  0xf9   : > { %v548_v44 = vmax.f32 %v488_v41, 0.0 }
  0xfb   : > { %v573_v47 = vpack.c.bf16 %v548_v44, %v547_v43 }
  0xfd   : > { %689 = vmatmul.bf16.gmra.mxu1 %v573_v47 }
  0xfe   : > { %v490_v50 = vpop.f32.mrf.mxu0 }
  0xff   : > { %v491_v53 = vadd.f32 %v1535_v37, %v490_v50 }
 0x101   : > { %1267 = vmatmul.msk.bf16.gmra.mxu0 %vm397_vm0, %v384_v49  ;;  %v549_v56 = vmax.f32 %v491_v53, 0.0 }
 0x106   : > { %v492_v54 = vpop.f32.mrf.mxu0 }
 0x107   : > { %v493_v55 = vadd.f32 %v1535_v37, %v492_v54 }
 0x109   : > { %v550_v57 = vmax.f32 %v493_v55, 0.0 }
 0x10b   : > { %v574_v58 = vpack.c.bf16 %v550_v57, %v549_v56 }
 0x10d   : > { %694 = vmatmul.bf16.gmra.mxu1 %v574_v58 }
 0x10e   : > { %v495_v59 = vpop.f32.mrf.mxu0 }
 0x10f   : > { %v496_v60 = vadd.f32 %v1535_v37, %v495_v59 }
 0x111   : > { %v551_v63 = vmax.f32 %v496_v60, 0.0 }
 0x116   : > { %v497_v61 = vpop.f32.mrf.mxu0 }
 0x117   : > { %v498_v62 = vadd.f32 %v1535_v37, %v497_v61 }
 0x119   : > { %v552_v0 = vmax.f32 %v498_v62, 0.0 }
 0x11a   : > { %v660_v1 = vpop.f32.mrf.mxu1 }
 0x11b   : > { %v575_v2 = vpack.c.bf16 %v552_v0, %v551_v63  ;;  %v661_v5 = vadd.f32 %v1604_v3, %v660_v1 }
 0x11d   : > { %699 = vmatmul.bf16.gmra.mxu1 %v575_v2  ;;  %v740_v8 = vmax.f32 %v661_v5, 0.0 }
 0x11e   : > { %v500_v4 = vpop.f32.mrf.mxu0 }
 0x11f   : > { %v501_v9 = vadd.f32 %v1535_v37, %v500_v4 }
 0x121   : > { %v553_v14 = vmax.f32 %v501_v9, 0.0 }
 0x122   : > { %v662_v6 = vpop.f32.mrf.mxu1 }
 0x123   : > { %v663_v7 = vadd.f32 %v1604_v3, %v662_v6 }
 0x125   : > { %v741_v10 = vmax.f32 %v663_v7, 0.0 }
 0x126   : > { %v502_v11 = vpop.f32.mrf.mxu0 }
 0x127   : > { %v503_v12 = vadd.f32 %v1535_v37, %v502_v11  ;;  %v772_v13 = vpack.c.bf16 %v741_v10, %v740_v8 }
 0x129   : > { %v554_v15 = vmax.f32 %v503_v12, 0.0  ;;  %864 = vmatmul.bf16.vlgmr.msra.gmra.mxu2 %v772_v13 }
 0x12a   : > { %v665_v16 = vpop.f32.mrf.mxu1 }
 0x12b   : > { %v576_v17 = vpack.c.bf16 %v554_v15, %v553_v14  ;;  %v666_v19 = vadd.f32 %v1604_v3, %v665_v16 }
 0x12d   : > { %704 = vmatmul.bf16.gmra.mxu1 %v576_v17  ;;  %v742_v22 = vmax.f32 %v666_v19, 0.0 }
 0x12e   : > { %v505_v18 = vpop.f32.mrf.mxu0 }
 0x12f   : > { %v506_v23 = vadd.f32 %v1535_v37, %v505_v18 }
 0x131   : > { %v555_v28 = vmax.f32 %v506_v23, 0.0 }
 0x132   : > { %v667_v20 = vpop.f32.mrf.mxu1 }
 0x133   : > { %v668_v21 = vadd.f32 %v1604_v3, %v667_v20 }
 0x135   : > { %v743_v24 = vmax.f32 %v668_v21, 0.0 }
 0x136   : > { %v507_v25 = vpop.f32.mrf.mxu0 }
 0x137   : > { %v508_v26 = vadd.f32 %v1535_v37, %v507_v25  ;;  %v773_v27 = vpack.c.bf16 %v743_v24, %v742_v22  ;;  %v1390_v25 = vld [vmem:[%s1831_s7 + $0x38] sm:$0xff] }
 0x138   : > { %1061 = vmatpush.bf16.msra.mxu3 %v1390_v25 }
 0x139   : > { %v556_v29 = vmax.f32 %v508_v26, 0.0  ;;  %869 = vmatmul.bf16.gmra.mxu2 %v773_v27  ;;  %v1389_v27 = vld [vmem:[%s1831_s7 + $0x30] sm:$0xff] }
 0x13a   : > { %v670_v30 = vpop.f32.mrf.mxu1 }
 0x13b   : > { %v577_v31 = vpack.c.bf16 %v556_v29, %v555_v28  ;;  %v671_v33 = vadd.f32 %v1604_v3, %v670_v30 }
 0x13c   : > { %1062 = vmatpush.bf16.msra.mxu3 %v1389_v27 }
 0x13d   : > { %709 = vmatmul.bf16.gmra.mxu1 %v577_v31  ;;  %v744_v36 = vmax.f32 %v671_v33, 0.0  ;;  %v1388_v31 = vld [vmem:[%s1831_s7 + $0x28] sm:$0xff] }
 0x13e   : > { %v510_v32 = vpop.f32.mrf.mxu0 }
 0x13f   : > { %v511_v38 = vadd.f32 %v1535_v37, %v510_v32 }
 0x140   : > { %1063 = vmatpush.bf16.msra.mxu3 %v1388_v31 }
 0x141   : > { %v557_v43 = vmax.f32 %v511_v38, 0.0 }
 0x142   : > { %v672_v34 = vpop.f32.mrf.mxu1 }
 0x143   : > { %v673_v35 = vadd.f32 %v1604_v3, %v672_v34 }
 0x145   : > { %v745_v39 = vmax.f32 %v673_v35, 0.0 }
 0x146   : > { %v512_v40 = vpop.f32.mrf.mxu0 }
 0x147   : > { %v513_v41 = vadd.f32 %v1535_v37, %v512_v40  ;;  %v774_v42 = vpack.c.bf16 %v745_v39, %v744_v36  ;;  %v1387_v36 = vld [vmem:[%s1831_s7 + $0x20] sm:$0xff] }
 0x148   : > { %1064 = vmatpush.bf16.msra.mxu3 %v1387_v36 }
 0x149   : > { %v558_v44 = vmax.f32 %v513_v41, 0.0  ;;  %874 = vmatmul.bf16.gmra.mxu2 %v774_v42 }
 0x14a   : > { %v675_v45 = vpop.f32.mrf.mxu1 }
 0x14b   : > { %v578_v46 = vpack.c.bf16 %v558_v44, %v557_v43  ;;  %v676_v48 = vadd.f32 %v1604_v3, %v675_v45  ;;  %v1386_v44 = vld [vmem:[%s1831_s7 + $0x18] sm:$0xff] }
 0x14c   : > { %1065 = vmatpush.bf16.msra.mxu3 %v1386_v44 }
 0x14d   : > { %714 = vmatmul.bf16.gmra.mxu1 %v578_v46  ;;  %v746_v51 = vmax.f32 %v676_v48, 0.0  ;;  %v1385_v46 = vld [vmem:[%s1831_s7 + $0x10] sm:$0xff]  ;;  %v1384_v48 = vld [vmem:[%s1831_s7 + $0x8] sm:$0xff] }
 0x14e   : > { %v515_v47 = vpop.f32.mrf.mxu0 }
 0x14f   : > { %v516_v52 = vadd.f32 %v1535_v37, %v515_v47 }
 0x150   : > { %1066 = vmatpush.bf16.msra.mxu3 %v1385_v46 }
 0x151   : > { %v559_v57 = vmax.f32 %v516_v52, 0.0  ;;  %v1383_v52 = vld [vmem:[%s1831_s7] sm:$0xff] }
 0x152   : > { %v677_v49 = vpop.f32.mrf.mxu1 }
 0x153   : > { %v678_v50 = vadd.f32 %v1604_v3, %v677_v49 }
 0x154   : > { %1067 = vmatpush.bf16.msra.mxu3 %v1384_v48 }
 0x155   : > { %v747_v53 = vmax.f32 %v678_v50, 0.0 }
 0x156   : > { %v517_v54 = vpop.f32.mrf.mxu0 }
 0x157   : > { %v518_v55 = vadd.f32 %v1535_v37, %v517_v54  ;;  %v775_v56 = vpack.c.bf16 %v747_v53, %v746_v51 }
 0x158   : > { %1068 = vmatpush.bf16.msra.mxu3 %v1383_v52 }
 0x159   : > { %v560_v58 = vmax.f32 %v518_v55, 0.0  ;;  %879 = vmatmul.bf16.gmra.mxu2 %v775_v56 }
 0x15a   : > { %v680_v59 = vpop.f32.mrf.mxu1 }
 0x15b   : > { %v579_v60 = vpack.c.bf16 %v560_v58, %v559_v57  ;;  %v681_v62 = vadd.f32 %v1604_v3, %v680_v59 }
 0x15d   : > { %719 = vmatmul.bf16.gmra.mxu1 %v579_v60  ;;  %v748_v1 = vmax.f32 %v681_v62, 0.0 }
 0x15e   : > { %v520_v61 = vpop.f32.mrf.mxu0 }
 0x15f   : > { %v521_v2 = vadd.f32 %v1535_v37, %v520_v61 }
 0x161   : > { %v561_v8 = vmax.f32 %v521_v2, 0.0 }
 0x162   : > { %v682_v63 = vpop.f32.mrf.mxu1 }
 0x163   : > { %v683_v0 = vadd.f32 %v1604_v3, %v682_v63  ;;  %v1665_v63 = vld [vmem:[%s1830_s6] ss:$0 sm:$0xff] }
 0x165   : > { %v749_v4 = vmax.f32 %v683_v0, 0.0 }
 0x166   : > { %v522_v5 = vpop.f32.mrf.mxu0 }
 0x167   : > { %v523_v6 = vadd.f32 %v1535_v37, %v522_v5  ;;  %v776_v7 = vpack.c.bf16 %v749_v4, %v748_v1 }
 0x169   : > { %v562_v9 = vmax.f32 %v523_v6, 0.0  ;;  %884 = vmatmul.bf16.gmra.mxu2 %v776_v7 }
 0x16a   : > { %v685_v10 = vpop.f32.mrf.mxu1 }
 0x16b   : > { %v580_v11 = vpack.c.bf16 %v562_v9, %v561_v8  ;;  %v686_v13 = vadd.f32 %v1604_v3, %v685_v10 }
 0x16d   : > { %724 = vmatmul.bf16.gmra.mxu1 %v580_v11  ;;  %v750_v16 = vmax.f32 %v686_v13, 0.0 }
 0x16e   : > { %v525_v12 = vpop.f32.mrf.mxu0 }
 0x16f   : > { %v526_v17 = vadd.f32 %v1535_v37, %v525_v12 }
 0x171   : > { %v563_v22 = vmax.f32 %v526_v17, 0.0 }
 0x172   : > { %v687_v14 = vpop.f32.mrf.mxu1 }
 0x173   : > { %v688_v15 = vadd.f32 %v1604_v3, %v687_v14 }
 0x175   : > { %v751_v18 = vmax.f32 %v688_v15, 0.0 }
 0x176   : > { %v527_v19 = vpop.f32.mrf.mxu0 }
 0x177   : > { %v528_v20 = vadd.f32 %v1535_v37, %v527_v19  ;;  %v777_v21 = vpack.c.bf16 %v751_v18, %v750_v16 }
 0x179   : > { %v564_v23 = vmax.f32 %v528_v20, 0.0  ;;  %889 = vmatmul.bf16.gmra.mxu2 %v777_v21 }
 0x17a   : > { %v690_v24 = vpop.f32.mrf.mxu1 }
 0x17b   : > { %v581_v26 = vpack.c.bf16 %v564_v23, %v563_v22  ;;  %v691_v29 = vadd.f32 %v1604_v3, %v690_v24 }
 0x17d   : > { %729 = vmatmul.bf16.gmra.mxu1 %v581_v26  ;;  %v752_v33 = vmax.f32 %v691_v29, 0.0 }
 0x17e   : > { %v530_v28 = vpop.f32.mrf.mxu0 }
 0x17f   : > { %v531_v34 = vadd.f32 %v1535_v37, %v530_v28 }
 0x181   : > { %v565_v41 = vmax.f32 %v531_v34, 0.0 }
 0x182   : > { %v692_v30 = vpop.f32.mrf.mxu1 }
 0x183   : > { %v693_v32 = vadd.f32 %v1604_v3, %v692_v30 }
 0x185   : > { %v753_v35 = vmax.f32 %v693_v32, 0.0 }
 0x186   : > { %v532_v38 = vpop.f32.mrf.mxu0 }
 0x187   : > { %v533_v39 = vadd.f32 %v1535_v37, %v532_v38  ;;  %v778_v40 = vpack.c.bf16 %v753_v35, %v752_v33 }
 0x189   : > { %v566_v42 = vmax.f32 %v533_v39, 0.0  ;;  %894 = vmatmul.bf16.gmra.mxu2 %v778_v40 }
 0x18a   : > { %v695_v43 = vpop.f32.mrf.mxu1 }
 0x18b   : > { %v582_v45 = vpack.c.bf16 %v566_v42, %v565_v41  ;;  %v696_v37 = vadd.f32 %v1604_v3, %v695_v43 }
 0x18d   : > { %734 = vmatmul.bf16.gmra.mxu1 %v582_v45  ;;  %v754_v50 = vmax.f32 %v696_v37, 0.0 }
 0x192   : > { %v697_v47 = vpop.f32.mrf.mxu1 }
 0x193   : > { %v698_v49 = vadd.f32 %v1604_v3, %v697_v47 }
 0x195   : > { %v755_v51 = vmax.f32 %v698_v49, 0.0 }
 0x197   : > { %v779_v53 = vpack.c.bf16 %v755_v51, %v754_v50 }
 0x199   : > { %899 = vmatmul.bf16.gmra.mxu2 %v779_v53 }
 0x19a   : > { %v700_v54 = vpop.f32.mrf.mxu1 }
 0x19b   : > { %v701_v55 = vadd.f32 %v1604_v3, %v700_v54 }
 0x19d   : > { %v756_v58 = vmax.f32 %v701_v55, 0.0 }
 0x1a2   : > { %v702_v56 = vpop.f32.mrf.mxu1 }
 0x1a3   : > { %v703_v57 = vadd.f32 %v1604_v3, %v702_v56 }
 0x1a5   : > { %v757_v59 = vmax.f32 %v703_v57, 0.0 }
 0x1a7   : > { %v780_v60 = vpack.c.bf16 %v757_v59, %v756_v58 }
 0x1a9   : > { %904 = vmatmul.bf16.gmra.mxu2 %v780_v60 }
 0x1aa   : > { %v705_v61 = vpop.f32.mrf.mxu1 }
 0x1ab   : > { %v706_v0 = vadd.f32 %v1604_v3, %v705_v61 }
 0x1ac   : > { %v865_v62 = vpop.f32.mrf.mxu2 }
 0x1ad   : > { %v866_v2 = vadd.f32 %v1665_v63, %v865_v62  ;;  %v758_v6 = vmax.f32 %v706_v0, 0.0 }
 0x1af   : > { %v945_v9 = vmax.f32 %v866_v2, 0.0 }
 0x1b2   : > { %v707_v1 = vpop.f32.mrf.mxu1 }
 0x1b3   : > { %v708_v4 = vadd.f32 %v1604_v3, %v707_v1 }
 0x1b4   : > { %v867_v5 = vpop.f32.mrf.mxu2 }
 0x1b5   : > { %v759_v7 = vmax.f32 %v708_v4, 0.0  ;;  %v868_v8 = vadd.f32 %v1665_v63, %v867_v5 }
 0x1b7   : > { %v946_v10 = vmax.f32 %v868_v8, 0.0  ;;  %v781_v11 = vpack.c.bf16 %v759_v7, %v758_v6 }
 0x1b9   : > { %909 = vmatmul.bf16.gmra.mxu2 %v781_v11  ;;  %v977_v12 = vpack.c.bf16 %v946_v10, %v945_v9 }
 0x1ba   : > { %v710_v13 = vpop.f32.mrf.mxu1 }
 0x1bb   : > { %1069 = vmatmul.bf16.vlgmr.msra.gmra.mxu3 %v977_v12  ;;  %v711_v15 = vadd.f32 %v1604_v3, %v710_v13 }
 0x1bc   : > { %v870_v14 = vpop.f32.mrf.mxu2 }
 0x1bd   : > { %v871_v17 = vadd.f32 %v1665_v63, %v870_v14  ;;  %v760_v20 = vmax.f32 %v711_v15, 0.0 }
 0x1bf   : > { %v947_v23 = vmax.f32 %v871_v17, 0.0 }
 0x1c2   : > { %v712_v16 = vpop.f32.mrf.mxu1 }
 0x1c3   : > { %v713_v18 = vadd.f32 %v1604_v3, %v712_v16 }
 0x1c4   : > { %v872_v19 = vpop.f32.mrf.mxu2 }
 0x1c5   : > { %v761_v21 = vmax.f32 %v713_v18, 0.0  ;;  %v873_v22 = vadd.f32 %v1665_v63, %v872_v19 }
 0x1c7   : > { %v948_v24 = vmax.f32 %v873_v22, 0.0  ;;  %v782_v25 = vpack.c.bf16 %v761_v21, %v760_v20 }
 0x1c9   : > { %914 = vmatmul.bf16.gmra.mxu2 %v782_v25  ;;  %v978_v26 = vpack.c.bf16 %v948_v24, %v947_v23 }
 0x1ca   : > { %v715_v27 = vpop.f32.mrf.mxu1 }
 0x1cb   : > { %1074 = vmatmul.bf16.gmra.mxu3 %v978_v26  ;;  %v716_v29 = vadd.f32 %v1604_v3, %v715_v27 }
 0x1cc   : > { %v875_v28 = vpop.f32.mrf.mxu2 }
 0x1cd   : > { %v876_v31 = vadd.f32 %v1665_v63, %v875_v28  ;;  %v762_v34 = vmax.f32 %v716_v29, 0.0 }
 0x1cf   : > { %v949_v38 = vmax.f32 %v876_v31, 0.0 }
 0x1d2   : > { %v717_v30 = vpop.f32.mrf.mxu1 }
 0x1d3   : > { %v718_v32 = vadd.f32 %v1604_v3, %v717_v30 }
 0x1d4   : > { %v877_v33 = vpop.f32.mrf.mxu2 }
 0x1d5   : > { %v763_v35 = vmax.f32 %v718_v32, 0.0  ;;  %v878_v36 = vadd.f32 %v1665_v63, %v877_v33 }
 0x1d7   : > { %v950_v39 = vmax.f32 %v878_v36, 0.0  ;;  %v783_v40 = vpack.c.bf16 %v763_v35, %v762_v34 }
 0x1d9   : > { %919 = vmatmul.bf16.gmra.mxu2 %v783_v40  ;;  %v979_v41 = vpack.c.bf16 %v950_v39, %v949_v38 }
 0x1da   : > { %v720_v42 = vpop.f32.mrf.mxu1 }
 0x1db   : > { %1079 = vmatmul.bf16.gmra.mxu3 %v979_v41  ;;  %v721_v44 = vadd.f32 %v1604_v3, %v720_v42 }
 0x1dc   : > { %v880_v43 = vpop.f32.mrf.mxu2 }
 0x1dd   : > { %v881_v46 = vadd.f32 %v1665_v63, %v880_v43  ;;  %v764_v48 = vmax.f32 %v721_v44, 0.0 }
 0x1df   : > { %v951_v51 = vmax.f32 %v881_v46, 0.0 }
 0x1e2   : > { %v722_v45 = vpop.f32.mrf.mxu1 }
 0x1e3   : > { %v723_v37 = vadd.f32 %v1604_v3, %v722_v45 }
 0x1e4   : > { %v882_v47 = vpop.f32.mrf.mxu2 }
 0x1e5   : > { %v765_v49 = vmax.f32 %v723_v37, 0.0  ;;  %v883_v50 = vadd.f32 %v1665_v63, %v882_v47 }
 0x1e7   : > { %v784_v52 = vpack.c.bf16 %v765_v49, %v764_v48  ;;  %v952_v53 = vmax.f32 %v883_v50, 0.0  ;;  %v1702_v48 = vld [vmem:[%s1832_s8] ss:$0 sm:$0xff] }
 0x1e9   : > { %924 = vmatmul.bf16.gmra.mxu2 %v784_v52  ;;  %v980_v54 = vpack.c.bf16 %v952_v53, %v951_v51 }
 0x1ea   : > { %v725_v55 = vpop.f32.mrf.mxu1 }
 0x1eb   : > { %1084 = vmatmul.bf16.gmra.mxu3 %v980_v54  ;;  %v726_v57 = vadd.f32 %v1604_v3, %v725_v55 }
 0x1ec   : > { %v885_v56 = vpop.f32.mrf.mxu2 }
 0x1ed   : > { %v886_v59 = vadd.f32 %v1665_v63, %v885_v56  ;;  %v766_v62 = vmax.f32 %v726_v57, 0.0 }
 0x1ef   : > { %v953_v2 = vmax.f32 %v886_v59, 0.0 }
 0x1f2   : > { %v727_v58 = vpop.f32.mrf.mxu1 }
 0x1f3   : > { %v728_v60 = vadd.f32 %v1604_v3, %v727_v58 }
 0x1f4   : > { %v887_v61 = vpop.f32.mrf.mxu2 }
 0x1f5   : > { %v767_v0 = vmax.f32 %v728_v60, 0.0  ;;  %v888_v1 = vadd.f32 %v1665_v63, %v887_v61 }
 0x1f7   : > { %v785_v4 = vpack.c.bf16 %v767_v0, %v766_v62  ;;  %v954_v5 = vmax.f32 %v888_v1, 0.0 }
 0x1f9   : > { %929 = vmatmul.bf16.gmra.mxu2 %v785_v4  ;;  %v981_v6 = vpack.c.bf16 %v954_v5, %v953_v2 }
 0x1fa   : > { %v730_v7 = vpop.f32.mrf.mxu1 }
 0x1fb   : > { %1089 = vmatmul.bf16.gmra.mxu3 %v981_v6  ;;  %v731_v9 = vadd.f32 %v1604_v3, %v730_v7 }
 0x1fc   : > { %v890_v8 = vpop.f32.mrf.mxu2 }
 0x1fd   : > { %v891_v11 = vadd.f32 %v1665_v63, %v890_v8  ;;  %v768_v14 = vmax.f32 %v731_v9, 0.0 }
 0x1ff   : > { %v955_v17 = vmax.f32 %v891_v11, 0.0 }
 0x202   : > { %v732_v10 = vpop.f32.mrf.mxu1 }
 0x203   : > { %v733_v12 = vadd.f32 %v1604_v3, %v732_v10 }
 0x204   : > { %v892_v13 = vpop.f32.mrf.mxu2 }
 0x205   : > { %v769_v15 = vmax.f32 %v733_v12, 0.0  ;;  %v893_v16 = vadd.f32 %v1665_v63, %v892_v13 }
 0x207   : > { %v786_v18 = vpack.c.bf16 %v769_v15, %v768_v14  ;;  %v956_v19 = vmax.f32 %v893_v16, 0.0 }
 0x209   : > { %934 = vmatmul.bf16.gmra.mxu2 %v786_v18  ;;  %v982_v20 = vpack.c.bf16 %v956_v19, %v955_v17 }
 0x20a   : > { %v735_v21 = vpop.f32.mrf.mxu1 }
 0x20b   : > { %1094 = vmatmul.bf16.gmra.mxu3 %v982_v20  ;;  %v736_v23 = vadd.f32 %v1604_v3, %v735_v21 }
 0x20c   : > { %v895_v22 = vpop.f32.mrf.mxu2 }
 0x20d   : > { %v896_v25 = vadd.f32 %v1665_v63, %v895_v22  ;;  %v770_v28 = vmax.f32 %v736_v23, 0.0 }
 0x20f   : > { %v957_v31 = vmax.f32 %v896_v25, 0.0 }
 0x212   : > { %v737_v24 = vpop.f32.mrf.mxu1 }
 0x213   : > { %v738_v26 = vadd.f32 %v1604_v3, %v737_v24 }
 0x214   : > { %v897_v27 = vpop.f32.mrf.mxu2 }
 0x215   : > { %v771_v29 = vmax.f32 %v738_v26, 0.0  ;;  %v898_v30 = vadd.f32 %v1665_v63, %v897_v27 }
 0x217   : > { %v787_v32 = vpack.c.bf16 %v771_v29, %v770_v28  ;;  %v958_v33 = vmax.f32 %v898_v30, 0.0 }
 0x219   : > { %939 = vmatmul.bf16.gmra.mxu2 %v787_v32  ;;  %v983_v34 = vpack.c.bf16 %v958_v33, %v957_v31 }
 0x21b   : > { %1099 = vmatmul.bf16.gmra.mxu3 %v983_v34 }
 0x21c   : > { %v900_v35 = vpop.f32.mrf.mxu2 }
 0x21d   : > { %v901_v36 = vadd.f32 %v1665_v63, %v900_v35 }
 0x21f   : > { %v959_v40 = vmax.f32 %v901_v36, 0.0 }
 0x224   : > { %v902_v38 = vpop.f32.mrf.mxu2 }
 0x225   : > { %v903_v39 = vadd.f32 %v1665_v63, %v902_v38 }
 0x227   : > { %v960_v3 = vmax.f32 %v903_v39, 0.0 }
 0x229   : > { %v984_v41 = vpack.c.bf16 %v960_v3, %v959_v40 }
 0x22b   : > { %1104 = vmatmul.bf16.gmra.mxu3 %v984_v41 }
 0x22c   : > { %v905_v42 = vpop.f32.mrf.mxu2 }
 0x22d   : > { %v906_v43 = vadd.f32 %v1665_v63, %v905_v42 }
 0x22f   : > { %v961_v46 = vmax.f32 %v906_v43, 0.0 }
 0x234   : > { %v907_v44 = vpop.f32.mrf.mxu2 }
 0x235   : > { %v908_v45 = vadd.f32 %v1665_v63, %v907_v44 }
 0x237   : > { %v962_v37 = vmax.f32 %v908_v45, 0.0 }
 0x239   : > { %v985_v47 = vpack.c.bf16 %v962_v37, %v961_v46 }
 0x23b   : > { %1109 = vmatmul.bf16.gmra.mxu3 %v985_v47 }
 0x23c   : > { %v910_v49 = vpop.f32.mrf.mxu2 }
 0x23d   : > { %v911_v52 = vadd.f32 %v1665_v63, %v910_v49 }
 0x23e   : > { %v1070_v50 = vpop.f32.mrf.mxu3 }
 0x23f   : > { %v1071_v51 = vadd.f32 %v1702_v48, %v1070_v50  ;;  %v963_v56 = vmax.f32 %v911_v52, 0.0 }
 0x241   : > { %1151 = vst.msk [vmem:[%s1709_s23] sm:$0xff] %vm1150_vm1, %v1071_v51 }
 0x244   : > { %v912_v53 = vpop.f32.mrf.mxu2 }
 0x245   : > { %v913_v54 = vadd.f32 %v1665_v63, %v912_v53 }
 0x246   : > { %v1072_v55 = vpop.f32.mrf.mxu3 }
 0x247   : > { %v964_v57 = vmax.f32 %v913_v54, 0.0  ;;  %v1073_v58 = vadd.f32 %v1702_v48, %v1072_v55 }
 0x249   : > { %1152 = vst.msk [vmem:[%s1709_s23 + $0x8] sm:$0xff] %vm1150_vm1, %v1073_v58  ;;  %v986_v59 = vpack.c.bf16 %v964_v57, %v963_v56 }
 0x24b   : > { %1114 = vmatmul.bf16.gmra.mxu3 %v986_v59 }
 0x24c   : > { %v915_v60 = vpop.f32.mrf.mxu2 }
 0x24d   : > { %v916_v0 = vadd.f32 %v1665_v63, %v915_v60 }
 0x24e   : > { %v1075_v61 = vpop.f32.mrf.mxu3 }
 0x24f   : > { %v1076_v62 = vadd.f32 %v1702_v48, %v1075_v61  ;;  %v965_v5 = vmax.f32 %v916_v0, 0.0 }
 0x251   : > { %1153 = vst.msk [vmem:[%s1709_s23 + $0x10] sm:$0xff] %vm1150_vm1, %v1076_v62 }
 0x254   : > { %v917_v1 = vpop.f32.mrf.mxu2 }
 0x255   : > { %v918_v2 = vadd.f32 %v1665_v63, %v917_v1 }
 0x256   : > { %v1077_v4 = vpop.f32.mrf.mxu3 }
 0x257   : > { %v966_v6 = vmax.f32 %v918_v2, 0.0  ;;  %v1078_v7 = vadd.f32 %v1702_v48, %v1077_v4 }
 0x259   : > { %1154 = vst.msk [vmem:[%s1709_s23 + $0x18] sm:$0xff] %vm1150_vm1, %v1078_v7  ;;  %v987_v8 = vpack.c.bf16 %v966_v6, %v965_v5 }
 0x25b   : > { %1119 = vmatmul.bf16.gmra.mxu3 %v987_v8 }
 0x25c   : > { %v920_v9 = vpop.f32.mrf.mxu2 }
 0x25d   : > { %v921_v12 = vadd.f32 %v1665_v63, %v920_v9 }
 0x25e   : > { %v1080_v10 = vpop.f32.mrf.mxu3 }
 0x25f   : > { %v1081_v11 = vadd.f32 %v1702_v48, %v1080_v10  ;;  %v967_v16 = vmax.f32 %v921_v12, 0.0 }
 0x261   : > { %1155 = vst.msk [vmem:[%s1709_s23 + $0x20] sm:$0xff] %vm1150_vm1, %v1081_v11 }
 0x264   : > { %v922_v13 = vpop.f32.mrf.mxu2 }
 0x265   : > { %v923_v14 = vadd.f32 %v1665_v63, %v922_v13 }
 0x266   : > { %v1082_v15 = vpop.f32.mrf.mxu3 }
 0x267   : > { %v968_v17 = vmax.f32 %v923_v14, 0.0  ;;  %v1083_v18 = vadd.f32 %v1702_v48, %v1082_v15 }
 0x269   : > { %1156 = vst.msk [vmem:[%s1709_s23 + $0x28] sm:$0xff] %vm1150_vm1, %v1083_v18  ;;  %v988_v19 = vpack.c.bf16 %v968_v17, %v967_v16 }
 0x26b   : > { %1124 = vmatmul.bf16.gmra.mxu3 %v988_v19 }
 0x26c   : > { %v925_v20 = vpop.f32.mrf.mxu2 }
 0x26d   : > { %v926_v23 = vadd.f32 %v1665_v63, %v925_v20 }
 0x26e   : > { %v1085_v21 = vpop.f32.mrf.mxu3 }
 0x26f   : > { %v1086_v22 = vadd.f32 %v1702_v48, %v1085_v21  ;;  %v969_v27 = vmax.f32 %v926_v23, 0.0 }
 0x271   : > { %1157 = vst.msk [vmem:[%s1709_s23 + $0x30] sm:$0xff] %vm1150_vm1, %v1086_v22 }
 0x274   : > { %v927_v24 = vpop.f32.mrf.mxu2 }
 0x275   : > { %v928_v25 = vadd.f32 %v1665_v63, %v927_v24 }
 0x276   : > { %v1087_v26 = vpop.f32.mrf.mxu3 }
 0x277   : > { %v970_v28 = vmax.f32 %v928_v25, 0.0  ;;  %v1088_v29 = vadd.f32 %v1702_v48, %v1087_v26 }
 0x279   : > { %v989_v30 = vpack.c.bf16 %v970_v28, %v969_v27  ;;  %1158 = vst.msk [vmem:[%s1709_s23 + $0x38] sm:$0xff] %vm1150_vm1, %v1088_v29 }
 0x27b   : > { %1129 = vmatmul.bf16.gmra.mxu3 %v989_v30 }
 0x27c   : > { %v930_v31 = vpop.f32.mrf.mxu2 }
 0x27d   : > { %v931_v34 = vadd.f32 %v1665_v63, %v930_v31 }
 0x27e   : > { %v1090_v32 = vpop.f32.mrf.mxu3 }
 0x27f   : > { %v1091_v33 = vadd.f32 %v1702_v48, %v1090_v32  ;;  %v971_v39 = vmax.f32 %v931_v34, 0.0 }
 0x281   : > { %1159 = vst.msk [vmem:[%s1709_s23 + $0x40] sm:$0xff] %vm1150_vm1, %v1091_v33 }
 0x284   : > { %v932_v35 = vpop.f32.mrf.mxu2 }
 0x285   : > { %v933_v36 = vadd.f32 %v1665_v63, %v932_v35 }
 0x286   : > { %v1092_v38 = vpop.f32.mrf.mxu3 }
 0x287   : > { %v972_v40 = vmax.f32 %v933_v36, 0.0  ;;  %v1093_v3 = vadd.f32 %v1702_v48, %v1092_v38 }
 0x289   : > { %v990_v41 = vpack.c.bf16 %v972_v40, %v971_v39  ;;  %1160 = vst.msk [vmem:[%s1709_s23 + $0x48] sm:$0xff] %vm1150_vm1, %v1093_v3 }
 0x28b   : > { %1134 = vmatmul.bf16.gmra.mxu3 %v990_v41 }
 0x28c   : > { %v935_v42 = vpop.f32.mrf.mxu2 }
 0x28d   : > { %v936_v45 = vadd.f32 %v1665_v63, %v935_v42 }
 0x28e   : > { %v1095_v43 = vpop.f32.mrf.mxu3 }
 0x28f   : > { %v1096_v44 = vadd.f32 %v1702_v48, %v1095_v43  ;;  %v973_v49 = vmax.f32 %v936_v45, 0.0 }
 0x291   : > { %1161 = vst.msk [vmem:[%s1709_s23 + $0x50] sm:$0xff] %vm1150_vm1, %v1096_v44 }
 0x294   : > { %v937_v46 = vpop.f32.mrf.mxu2 }
 0x295   : > { %v938_v37 = vadd.f32 %v1665_v63, %v937_v46 }
 0x296   : > { %v1097_v47 = vpop.f32.mrf.mxu3 }
 0x297   : > { %v974_v50 = vmax.f32 %v938_v37, 0.0  ;;  %v1098_v51 = vadd.f32 %v1702_v48, %v1097_v47 }
 0x299   : > { %v991_v52 = vpack.c.bf16 %v974_v50, %v973_v49  ;;  %1162 = vst.msk [vmem:[%s1709_s23 + $0x58] sm:$0xff] %vm1150_vm1, %v1098_v51 }
 0x29b   : > { %1139 = vmatmul.bf16.gmra.mxu3 %v991_v52 }
 0x29c   : > { %v940_v53 = vpop.f32.mrf.mxu2 }
 0x29d   : > { %v941_v56 = vadd.f32 %v1665_v63, %v940_v53 }
 0x29e   : > { %v1100_v54 = vpop.f32.mrf.mxu3 }
 0x29f   : > { %v1101_v55 = vadd.f32 %v1702_v48, %v1100_v54  ;;  %v975_v60 = vmax.f32 %v941_v56, 0.0 }
 0x2a1   : > { %1163 = vst.msk [vmem:[%s1709_s23 + $0x60] sm:$0xff] %vm1150_vm1, %v1101_v55 }
 0x2a4   : > { %v942_v57 = vpop.f32.mrf.mxu2 }
 0x2a5   : > { %v943_v58 = vadd.f32 %v1665_v63, %v942_v57 }
 0x2a6   : > { %v1102_v59 = vpop.f32.mrf.mxu3 }
 0x2a7   : > { %v976_v61 = vmax.f32 %v943_v58, 0.0  ;;  %v1103_v62 = vadd.f32 %v1702_v48, %v1102_v59 }
 0x2a9   : > { %v992_v0 = vpack.c.bf16 %v976_v61, %v975_v60  ;;  %1164 = vst.msk [vmem:[%s1709_s23 + $0x68] sm:$0xff] %vm1150_vm1, %v1103_v62 }
 0x2ab   : > { %1144 = vmatmul.bf16.gmra.mxu3 %v992_v0 }
 0x2ae   : > { %v1105_v1 = vpop.f32.mrf.mxu3 }
 0x2af   : > { %v1106_v2 = vadd.f32 %v1702_v48, %v1105_v1 }
 0x2b1   : > { %1165 = vst.msk [vmem:[%s1709_s23 + $0x70] sm:$0xff] %vm1150_vm1, %v1106_v2 }
 0x2b6   : > { %v1107_v4 = vpop.f32.mrf.mxu3 }
 0x2b7   : > { %v1108_v63 = vadd.f32 %v1702_v48, %v1107_v4 }
 0x2b9   : > { %1166 = vst.msk [vmem:[%s1709_s23 + $0x78] sm:$0xff] %vm1150_vm1, %v1108_v63 }
 0x2be   : > { %v1110_v5 = vpop.f32.mrf.mxu3 }
 0x2bf   : > { %v1111_v6 = vadd.f32 %v1702_v48, %v1110_v5 }
 0x2c1   : > { %1167 = vst.msk [vmem:[%s1709_s23 + $0x80] sm:$0xff] %vm1150_vm1, %v1111_v6 }
 0x2c6   : > { %v1112_v7 = vpop.f32.mrf.mxu3 }
 0x2c7   : > { %v1113_v8 = vadd.f32 %v1702_v48, %v1112_v7 }
 0x2c9   : > { %1168 = vst.msk [vmem:[%s1709_s23 + $0x88] sm:$0xff] %vm1150_vm1, %v1113_v8 }
 0x2ce   : > { %v1115_v9 = vpop.f32.mrf.mxu3 }
 0x2cf   : > { %v1116_v10 = vadd.f32 %v1702_v48, %v1115_v9 }
 0x2d1   : > { %1169 = vst.msk [vmem:[%s1709_s23 + $0x90] sm:$0xff] %vm1150_vm1, %v1116_v10 }
 0x2d6   : > { %v1117_v11 = vpop.f32.mrf.mxu3 }
 0x2d7   : > { %v1118_v12 = vadd.f32 %v1702_v48, %v1117_v11 }
 0x2d9   : > { %1170 = vst.msk [vmem:[%s1709_s23 + $0x98] sm:$0xff] %vm1150_vm1, %v1118_v12 }
 0x2de   : > { %v1120_v13 = vpop.f32.mrf.mxu3 }
 0x2df   : > { %v1121_v14 = vadd.f32 %v1702_v48, %v1120_v13 }
 0x2e1   : > { %1171 = vst.msk [vmem:[%s1709_s23 + $0xa0] sm:$0xff] %vm1150_vm1, %v1121_v14 }
 0x2e6   : > { %v1122_v15 = vpop.f32.mrf.mxu3 }
 0x2e7   : > { %v1123_v16 = vadd.f32 %v1702_v48, %v1122_v15 }
 0x2e9   : > { %1172 = vst.msk [vmem:[%s1709_s23 + $0xa8] sm:$0xff] %vm1150_vm1, %v1123_v16 }
 0x2ee   : > { %v1125_v17 = vpop.f32.mrf.mxu3 }
 0x2ef   : > { %v1126_v18 = vadd.f32 %v1702_v48, %v1125_v17 }
 0x2f1   : > { %1173 = vst.msk [vmem:[%s1709_s23 + $0xb0] sm:$0xff] %vm1150_vm1, %v1126_v18 }
 0x2f6   : > { %v1127_v19 = vpop.f32.mrf.mxu3 }
 0x2f7   : > { %v1128_v20 = vadd.f32 %v1702_v48, %v1127_v19 }
 0x2f9   : > { %1174 = vst.msk [vmem:[%s1709_s23 + $0xb8] sm:$0xff] %vm1150_vm1, %v1128_v20 }
 0x2fe   : > { %v1130_v21 = vpop.f32.mrf.mxu3 }
 0x2ff   : > { %v1131_v22 = vadd.f32 %v1702_v48, %v1130_v21 }
 0x301   : > { %1175 = vst.msk [vmem:[%s1709_s23 + $0xc0] sm:$0xff] %vm1150_vm1, %v1131_v22 }
 0x306   : > { %v1132_v23 = vpop.f32.mrf.mxu3 }
 0x307   : > { %v1133_v24 = vadd.f32 %v1702_v48, %v1132_v23 }
 0x309   : > { %1176 = vst.msk [vmem:[%s1709_s23 + $0xc8] sm:$0xff] %vm1150_vm1, %v1133_v24 }
 0x30e   : > { %v1135_v25 = vpop.f32.mrf.mxu3 }
 0x30f   : > { %v1136_v26 = vadd.f32 %v1702_v48, %v1135_v25 }
 0x311   : > { %1177 = vst.msk [vmem:[%s1709_s23 + $0xd0] sm:$0xff] %vm1150_vm1, %v1136_v26 }
 0x316   : > { %v1137_v27 = vpop.f32.mrf.mxu3 }
 0x317   : > { %v1138_v28 = vadd.f32 %v1702_v48, %v1137_v27 }
 0x319   : > { %1178 = vst.msk [vmem:[%s1709_s23 + $0xd8] sm:$0xff] %vm1150_vm1, %v1138_v28 }
 0x31e   : > { %v1140_v29 = vpop.f32.mrf.mxu3 }
 0x31f   : > { %v1141_v30 = vadd.f32 %v1702_v48, %v1140_v29 }
 0x321   : > { %1179 = vst.msk [vmem:[%s1709_s23 + $0xe0] sm:$0xff] %vm1150_vm1, %v1141_v30 }
 0x326   : > { %v1142_v31 = vpop.f32.mrf.mxu3 }
 0x327   : > { %v1143_v32 = vadd.f32 %v1702_v48, %v1142_v31 }
 0x329   : > { %1180 = vst.msk [vmem:[%s1709_s23 + $0xe8] sm:$0xff] %vm1150_vm1, %v1143_v32 }
 0x32e   : > { %v1145_v33 = vpop.f32.mrf.mxu3 }
 0x32f   : > { %v1146_v34 = vadd.f32 %v1702_v48, %v1145_v33 }
 0x331   : > { %1181 = vst.msk [vmem:[%s1709_s23 + $0xf0] sm:$0xff] %vm1150_vm1, %v1146_v34 }
 0x336   : > { %v1147_v35 = vpop.f32.mrf.mxu3 }
 0x337   : > { %v1148_v36 = vadd.f32 %v1702_v48, %v1147_v35 }
 0x339   : > { %1182 = vst.msk [vmem:[%s1709_s23 + $0xf8] sm:$0xff] %vm1150_vm1, %v1148_v36 }
 0x33a PF: > { %s19_s30 = sadd.s32 1, %s1409_s30  }
 0x33b   : > { %p16_p4 = scmp.ge.s32.totalorder %s19_s30, 4  }
 0x33d   :  { %18 = sbr.rel (!%p16_p4) target bundleno = 1 (0x1), region = 86 }

</bundles_post_ra>
